<compile_context>
chip_gen: v7x
topology: tpu7x:2x2x1
jax: 0.10.0
libtpu: 0.0.40
codegen_flags: <defaults>
</compile_context>

<pallas_src>
import functools

import jax
import jax.numpy as jnp
import numpy as np
from jax.experimental import pallas as pl
from jax.experimental.pallas import tpu as pltpu


def _round_up(x, m):
    return ((x + m - 1) // m) * m


# ----------------------------------------------------------------------------
# Glue (plain JAX): ball query + grouping (data-dependent gather).
# Reproduces pcdet stack QueryAndGroup semantics: for each query point take the
# first `nsample` points (in index order, same batch) with dist^2 < r^2, pad
# with the first found index, zero-out empty balls; relative xyz is
# concatenated in front of the features when use_xyz=True.
# TODO(synk): fuse this gather into the Pallas pipeline (scalar-prefetch index
# table + manual DMA gather) to avoid materializing the grouped tensor in HBM.
# ----------------------------------------------------------------------------
def query_and_group(xyz, xyz_bid, new_xyz, new_bid, features, radius, nsample,
                    use_xyz=True):
    N = xyz.shape[0]
    d2 = jnp.sum((new_xyz[:, None, :] - xyz[None, :, :]) ** 2, axis=-1)  # (M,N)
    same_batch = new_bid[:, None] == xyz_bid[None, :]
    valid = (d2 < radius * radius) & same_batch                           # (M,N)

    idx_range = jnp.arange(N, dtype=jnp.int32)
    # Valid points keep their index as key, invalid points get key N+j so the
    # sort puts the first-in-order valid indices first.
    keys = jnp.where(valid, idx_range[None, :], N + idx_range[None, :])
    order = jnp.argsort(keys, axis=1)[:, :nsample].astype(jnp.int32)      # (M,S)

    cnt = jnp.sum(valid, axis=1)                                          # (M,)
    first = order[:, 0]
    slot = jnp.arange(nsample)[None, :]
    idx = jnp.where(slot < cnt[:, None], order, first[:, None])
    empty = cnt == 0
    idx = jnp.where(empty[:, None], 0, idx)

    grouped_xyz = xyz[idx] - new_xyz[:, None, :]                          # (M,S,3)
    if features is not None:
        grouped_feat = features[idx]                                      # (M,S,C)
        if use_xyz:
            grouped = jnp.concatenate([grouped_xyz, grouped_feat], -1)    # (M,S,3+C)
        else:
            grouped = grouped_feat
    else:
        assert use_xyz
        grouped = grouped_xyz
    grouped = jnp.where(empty[:, None, None], 0.0, grouped)
    return grouped


# ----------------------------------------------------------------------------
# Pallas kernel: shared MLP (BN folded into W, bias=0) + max pool over nsample.
# ----------------------------------------------------------------------------
def _make_mlp_pool_kernel(n_layers, nsample, tm, compute_dtype):
    def kernel(x_ref, *args):
        out_ref = args[-1]
        w_refs = args[:-1]
        h = x_ref[...]                                   # (cin_p, ns*tm)
        for l in range(n_layers):
            acc = jnp.dot(w_refs[l][...], h,
                          preferred_element_type=jnp.float32)
            acc = jnp.maximum(acc, 0.0)                  # ReLU in f32
            if l < n_layers - 1:
                h = acc.astype(compute_dtype)            # feed MXU in bf16
            else:
                h = acc                                  # keep f32 for pooling
        # max-pool over nsample: lane-aligned static slices of width tm.
        pooled = h[:, 0:tm]
        for s in range(1, nsample):
            pooled = jnp.maximum(pooled, h[:, s * tm:(s + 1) * tm])
        out_ref[...] = pooled                            # (cout_last, tm)
    return kernel


def mlp_and_pool(grouped, weights, *, tm_target=512,
                 compute_dtype=jnp.bfloat16):
    """grouped: (M, nsample, C_in)  ->  (M, C_out_last).

    weights[l]: (C_out_l, C_in_l) with eval-mode BN scale already folded in;
    weights[0] is padded on its input dim to a sublane-friendly cin_p.
    """
    M, ns, cin = grouped.shape
    n_layers = len(weights)
    cout_last = weights[-1].shape[0]
    cin_p = weights[0].shape[1]

    # Lane-dense tiling: tm multiple of 128, clamped to the (padded) problem.
    tm = min(_round_up(tm_target, 128), _round_up(max(M, 1), 128))
    M_p = _round_up(M, tm)
    n_blocks = M_p // tm

    g = grouped
    if cin_p != cin:
        g = jnp.pad(g, ((0, 0), (0, 0), (0, cin_p - cin)))
    if M_p != M:
        g = jnp.pad(g, ((0, M_p - M), (0, 0), (0, 0)))
    # (M_p, ns, cin_p) -> channel-major slab with columns (block, sample, pt).
    g = g.reshape(n_blocks, tm, ns, cin_p)
    g = g.transpose(3, 0, 2, 1).reshape(cin_p, n_blocks * ns * tm)
    g = g.astype(compute_dtype)
    ws = [w.astype(compute_dtype) for w in weights]

    in_specs = [pl.BlockSpec((cin_p, ns * tm), lambda i: (0, i))]
    in_specs += [pl.BlockSpec(w.shape, lambda i: (0, 0)) for w in ws]

    out_t = pl.pallas_call(
        _make_mlp_pool_kernel(n_layers, ns, tm, compute_dtype),
        out_shape=jax.ShapeDtypeStruct((cout_last, M_p), jnp.float32),
        grid=(n_blocks,),
        in_specs=in_specs,
        out_specs=pl.BlockSpec((cout_last, tm), lambda i: (0, i)),
        compiler_params=pltpu.CompilerParams(
            dimension_semantics=("parallel",),
            vmem_limit_bytes=32 * 1024 * 1024),
    )(g, *ws)
    return out_t.T[:M]                                   # (M, cout_last)


# ----------------------------------------------------------------------------
# Module-equivalent wrapper.
# ----------------------------------------------------------------------------
class StackSAModuleMSG:
    def __init__(self, *, radii, nsamples, mlps, use_xyz=True,
                 pool_method='max_pool', key=None,
                 compute_dtype=jnp.bfloat16, tm_target=512):
        assert len(radii) == len(nsamples) == len(mlps)
        assert pool_method == 'max_pool'  # TODO(synk): avg_pool variant
        self.radii = radii
        self.nsamples = nsamples
        self.use_xyz = use_xyz
        self.pool_method = pool_method
        self.compute_dtype = compute_dtype
        self.tm_target = tm_target
        self.weights = []   # per scale: list of (c_out, c_in[_pad]) matrices
        key = key if key is not None else jax.random.PRNGKey(0)
        eps = 1e-5
        bn_scale = 1.0 / np.sqrt(1.0 + eps)   # eval-mode BN fold (g=1,b=0,m=0,v=1)
        for i in range(len(radii)):
            spec = list(mlps[i])
            if use_xyz:
                spec[0] += 3
            layers = []
            for k in range(len(spec) - 1):
                key, sub = jax.random.split(key)
                c_in, c_out = spec[k], spec[k + 1]
                # Conv2d(c_in, c_out, 1, bias=False), kaiming_normal_ init:
                # std = sqrt(2 / fan_in), fan_in = c_in * 1 * 1.
                w = jax.random.normal(sub, (c_out, c_in), jnp.float32) * \
                    np.sqrt(2.0 / c_in)
                w = w * bn_scale                      # fold BN scale; bias is 0
                if k == 0:
                    c_in_p = _round_up(c_in, 8)       # sublane-pad first layer K
                    if c_in_p != c_in:
                        w = jnp.pad(w, ((0, 0), (0, c_in_p - c_in)))
                layers.append(jnp.asarray(w, jnp.float32))
            self.weights.append(layers)

    def __call__(self, xyz, xyz_batch_cnt, new_xyz, new_xyz_batch_cnt,
                 features=None):
        xyz_bid = jnp.asarray(
            np.repeat(np.arange(len(xyz_batch_cnt)), np.asarray(xyz_batch_cnt)),
            dtype=jnp.int32)
        new_bid = jnp.asarray(
            np.repeat(np.arange(len(new_xyz_batch_cnt)),
                      np.asarray(new_xyz_batch_cnt)),
            dtype=jnp.int32)

        new_features_list = []
        for k in range(len(self.radii)):
            grouped = query_and_group(
                xyz, xyz_bid, new_xyz, new_bid, features,
                self.radii[k], self.nsamples[k], use_xyz=self.use_xyz)
            pooled = mlp_and_pool(
                grouped, self.weights[k],
                tm_target=self.tm_target, compute_dtype=self.compute_dtype)
            new_features_list.append(pooled)
        # TODO(synk): fuse all MSG scales into one pallas_call (pad nsample to
        # max and stack weights) to amortize launch cost and widen output lanes.
        new_features = jnp.concatenate(new_features_list, axis=1)
        return new_xyz, new_features


if __name__ == "__main__":
    key = jax.random.PRNGKey(0)
    k_xyz, k_new, k_feat, k_params = jax.random.split(key, 4)

    batch_size = 2
    N1, N2 = 24, 24
    M1, M2 = 16, 16
    C = 4

    xyz = jax.random.uniform(k_xyz, (N1 + N2, 3), jnp.float32)
    new_xyz = jax.random.uniform(k_new, (M1 + M2, 3), jnp.float32)
    features = jax.random.normal(k_feat, (N1 + N2, C), jnp.float32)
    xyz_batch_cnt = jnp.array([N1, N2], dtype=jnp.int32)
    new_xyz_batch_cnt = jnp.array([M1, M2], dtype=jnp.int32)

    module = StackSAModuleMSG(
        radii=[0.5, 1.0],
        nsamples=[8, 16],
        mlps=[[C, 16, 32], [C, 16, 32]],
        use_xyz=True,
        pool_method='max_pool',
        key=k_params,
    )

    out_xyz, out_feat = module(xyz, xyz_batch_cnt, new_xyz,
                               new_xyz_batch_cnt, features)
    out_feat = jax.block_until_ready(out_feat)
    assert out_xyz.shape == (M1 + M2, 3)
    assert out_feat.shape == (M1 + M2, 64)
    assert bool(jnp.all(jnp.isfinite(out_feat)))
    print("KERNEL_OK")
</pallas_src>

<mosaic_0001>
module attributes {stable_mosaic.version = 11 : i64} {
  func.func @kernel(%arg0: i32, %arg1: memref<8x1024xbf16, #tpu.memory_space<vmem>>, %arg2: memref<16x8xbf16, #tpu.memory_space<vmem>>, %arg3: memref<32x16xbf16, #tpu.memory_space<vmem>>, %arg4: memref<32x128xf32, #tpu.memory_space<vmem>>) attributes {dimension_semantics = [#tpu.dimension_semantics<parallel>], iteration_bounds = array<i64: 1>, scalar_prefetch = 0 : i64, scratch_operands = 0 : i64, tpu.core_type = #tpu.core_type<tc>, window_params = [{transform_indices = @transform_0, window_bounds = array<i64: 8, 1024>}, {pipeline_mode = #tpu.pipeline_mode<synchronous>, transform_indices = @transform_1, window_bounds = array<i64: 16, 8>}, {pipeline_mode = #tpu.pipeline_mode<synchronous>, transform_indices = @transform_2, window_bounds = array<i64: 32, 16>}, {transform_indices = @transform_3, window_bounds = array<i64: 32, 128>}]} {
    %c0 = arith.constant 0 : index
    %c0_0 = arith.constant 0 : index
    %0 = vector.load %arg1[%c0, %c0_0] : memref<8x1024xbf16, #tpu.memory_space<vmem>>, vector<8x1024xbf16>
    %c0_1 = arith.constant 0 : index
    %c0_2 = arith.constant 0 : index
    %1 = vector.load %arg2[%c0_1, %c0_2] : memref<16x8xbf16, #tpu.memory_space<vmem>>, vector<16x8xbf16>
    %cst = arith.constant dense<0.000000e+00> : vector<16x1024xf32>
    %2 = tpu.matmul %1, %0, %cst {dimension_numbers = #tpu.dot_dimension_numbers<[1], [0], [0], [1], [0, 0, 1, 1], [], []>} : vector<16x8xbf16>, vector<8x1024xbf16>, vector<16x1024xf32> -> vector<16x1024xf32>
    %cst_3 = arith.constant 0.000000e+00 : f32
    %3 = vector.broadcast %cst_3 : f32 to vector<16x1024xf32>
    %4 = arith.maximumf %2, %3 : vector<16x1024xf32>
    %5 = arith.truncf %4 : vector<16x1024xf32> to vector<16x1024xbf16>
    %c0_4 = arith.constant 0 : index
    %c0_5 = arith.constant 0 : index
    %6 = vector.load %arg3[%c0_4, %c0_5] : memref<32x16xbf16, #tpu.memory_space<vmem>>, vector<32x16xbf16>
    %cst_6 = arith.constant dense<0.000000e+00> : vector<32x1024xf32>
    %7 = tpu.matmul %6, %5, %cst_6 {dimension_numbers = #tpu.dot_dimension_numbers<[1], [0], [0], [1], [0, 0, 1, 1], [], []>} : vector<32x16xbf16>, vector<16x1024xbf16>, vector<32x1024xf32> -> vector<32x1024xf32>
    %cst_7 = arith.constant 0.000000e+00 : f32
    %8 = vector.broadcast %cst_7 : f32 to vector<32x1024xf32>
    %9 = arith.maximumf %7, %8 : vector<32x1024xf32>
    %10 = vector.extract_strided_slice %9 {offsets = [0, 0], sizes = [32, 128], strides = [1, 1]} : vector<32x1024xf32> to vector<32x128xf32>
    %11 = vector.extract_strided_slice %9 {offsets = [0, 128], sizes = [32, 128], strides = [1, 1]} : vector<32x1024xf32> to vector<32x128xf32>
    %12 = arith.maximumf %10, %11 : vector<32x128xf32>
    %13 = vector.extract_strided_slice %9 {offsets = [0, 256], sizes = [32, 128], strides = [1, 1]} : vector<32x1024xf32> to vector<32x128xf32>
    %14 = arith.maximumf %12, %13 : vector<32x128xf32>
    %15 = vector.extract_strided_slice %9 {offsets = [0, 384], sizes = [32, 128], strides = [1, 1]} : vector<32x1024xf32> to vector<32x128xf32>
    %16 = arith.maximumf %14, %15 : vector<32x128xf32>
    %17 = vector.extract_strided_slice %9 {offsets = [0, 512], sizes = [32, 128], strides = [1, 1]} : vector<32x1024xf32> to vector<32x128xf32>
    %18 = arith.maximumf %16, %17 : vector<32x128xf32>
    %19 = vector.extract_strided_slice %9 {offsets = [0, 640], sizes = [32, 128], strides = [1, 1]} : vector<32x1024xf32> to vector<32x128xf32>
    %20 = arith.maximumf %18, %19 : vector<32x128xf32>
    %21 = vector.extract_strided_slice %9 {offsets = [0, 768], sizes = [32, 128], strides = [1, 1]} : vector<32x1024xf32> to vector<32x128xf32>
    %22 = arith.maximumf %20, %21 : vector<32x128xf32>
    %23 = vector.extract_strided_slice %9 {offsets = [0, 896], sizes = [32, 128], strides = [1, 1]} : vector<32x1024xf32> to vector<32x128xf32>
    %24 = arith.maximumf %22, %23 : vector<32x128xf32>
    %c0_8 = arith.constant 0 : index
    %c0_9 = arith.constant 0 : index
    %25 = vector.load %arg4[%c0_8, %c0_9] : memref<32x128xf32, #tpu.memory_space<vmem>>, vector<32x128xf32>
    tpu.vector_store %arg4[%c0_8, %c0_9], %24 {strides = array<i32>} : memref<32x128xf32, #tpu.memory_space<vmem>>, vector<32x128xf32>,
    return
  }
  func.func @transform_0(%arg0: i32) -> (i32, i32) {
    %c0_i32 = arith.constant 0 : i32
    %c0_i32_0 = arith.constant 0 : i32
    return %c0_i32, %arg0 : i32, i32
  }
  func.func @transform_1(%arg0: i32) -> (i32, i32) {
    %c0_i32 = arith.constant 0 : i32
    %c0_i32_0 = arith.constant 0 : i32
    %c0_i32_1 = arith.constant 0 : i32
    return %c0_i32, %c0_i32_0 : i32, i32
  }
  func.func @transform_2(%arg0: i32) -> (i32, i32) {
    %c0_i32 = arith.constant 0 : i32
    %c0_i32_0 = arith.constant 0 : i32
    %c0_i32_1 = arith.constant 0 : i32
    return %c0_i32, %c0_i32_0 : i32, i32
  }
  func.func @transform_3(%arg0: i32) -> (i32, i32) {
    %c0_i32 = arith.constant 0 : i32
    %c0_i32_0 = arith.constant 0 : i32
    return %c0_i32, %arg0 : i32, i32
  }
}

</mosaic_0001>

<bundles_post_ra>
// kernel: tpu_custom_call.1
= control target key start
LH: loop header
LB: loop body
LE: loop exit
PB: predicated region body
PF: predicated region fallthrough
CT: control target
= control target key end

     0   :  { %vm51_vm0 = vcmask 1043456   ;;  %v651_v6 = vmov 0   ;;  %vm47_vm1 = vcmask 64512   ;;  %s736_s0 = inlined_call_operand.vmem [shape: bf16[8,1024], index: 0, kind: input, shape index: {}]   ;;  %s737_s1 = inlined_call_operand.vmem [shape: bf16[16,8], index: 1, kind: input, shape index: {}]   ;;  %s738_s2 = inlined_call_operand.vmem [shape: bf16[32,16], index: 2, kind: input, shape index: {}]   ;;  %s739_s3 = inlined_call_operand.hbm [shape: f32[32,128], index: 3, kind: output, shape index: {}]  }
   0x1   :  { %v16_v0 = vld [vmem:[%s736_s0] sm:$0xff]  ;;  %v17_v1 = vld [vmem:[%s736_s0 + $0x8] sm:$0xff]  ;;  %108 = vmatprep.mubr.bf16.mxu0 %v651_v6  ;;  %v18_v8 = vld [vmem:[%s736_s0 + $0x10] sm:$0xff]  ;;  %151 = vmatprep.mubr.bf16.mxu1 %v651_v6 }
   0x2   :  { %v587_v2 = vcombine.high %v16_v0, %v16_v0  ;;  %v589_v3 = vcombine.high %v17_v1, %v17_v1  ;;  %v586_v4 = vcombine.low %v16_v0, %v16_v0  ;;  %v588_v5 = vcombine.low %v17_v1, %v17_v1  ;;  %v620_v7 = vld [vmem:[%s737_s1] sm:$0xff]   ;;  %v19_v10 = vld [vmem:[%s736_s0 + $0x18] sm:$0xff] }
   0x3   :  { %v591_v9 = vcombine.high %v18_v8, %v18_v8  ;;  %v590_v11 = vcombine.low %v18_v8, %v18_v8  ;;  %v593_v14 = vcombine.high %v19_v10, %v19_v10  ;;  %v592_v15 = vcombine.low %v19_v10, %v19_v10 }
   0x4   :  { %594 = vmatprep.subr.msk.bf16.mxu0 %vm51_vm0, %v587_v2  ;;  %596 = vmatprep.subr.msk.bf16.mxu1 %vm51_vm0, %v589_v3  ;;  %v53_v12 = vsel %vm51_vm0, %v586_v4, 0  ;;  %v59_v13 = vsel %vm51_vm0, %v588_v5, 0 }
   0x5   :  { %77 = vmatpush1.bf16.msra.mxu0 %v53_v12  ;;  %120 = vmatpush1.bf16.msra.mxu1 %v59_v13 }
   0x6   :  { %8 = vsyncpa [#allocation3], 0  ;;  %598 = vmatprep.subr.msk.bf16.mxu0 %vm51_vm0, %v591_v9  ;;  %600 = vmatprep.subr.msk.bf16.mxu1 %vm51_vm0, %v593_v14  ;;  %v65_v16 = vsel %vm51_vm0, %v590_v11, 0  ;;  %v71_v17 = vsel %vm51_vm0, %v592_v15, 0  ;;  %v625_v40 = vld [vmem:[%s738_s2] sm:$0xff]   ;;  %vm286_vm2 = vcmask 130048  }
   0x7   :  { %v626_v59 = vld [vmem:[%s738_s2 + $0x8] sm:$0xff]   ;;  %s652_s2 = smov [#allocation2]  }
   0x8   :  { %595 = vmatmul.mubr.msk.bf16.vlgmr.msra.gmra.mrb[0].mxu0 %vm47_vm1, %v620_v7  ;;  %597 = vmatmul.mubr.msk.bf16.vlgmr.msra.gmra.mrb[0].mxu1 %vm47_vm1, %v620_v7  ;;  %s574_s24 = sshll.u32 %s652_s2, 4  ;;  %s575_s24 = int_to_ptr.vmem [resolvable:$true] %s574_s24 }
   0x9   :  { %163 = vmatpush1.bf16.msra.mxu0 %v65_v16  ;;  %206 = vmatpush1.bf16.msra.mxu1 %v71_v17  ;;  %s627_s25 = scalar_lea.vmem %s575_s24, 512  ;;  %p632_p1 = scmp.lt.s32.totalorder %s575_s24, %s575_s24 }
   0xa   :  { %194 = vmatprep.mubr.bf16.mxu0 %v651_v6  ;;  %237 = vmatprep.mubr.bf16.mxu1 %v651_v6  ;;  %p628_p0 = scmp.ne.s32.totalorder %s575_s24, %s627_s25  ;;  %p633_p2 = scmp.lt.s32.totalorder %s627_s25, %s627_s25 }
   0xc   :  { %p634_p3 = por %p633_p2, %p632_p1 }
   0xe   :  { %p635_p4 = pnand %p634_p3, %p628_p0 }
  0x10   :  { %599 = vmatmul.mubr.msk.bf16.vlgmr.msra.gmra.mrb[4].mxu0 %vm47_vm1, %v620_v7  ;;  %601 = vmatmul.mubr.msk.bf16.vlgmr.msra.gmra.mrb[4].mxu1 %vm47_vm1, %v620_v7 }
  0x11   :  { %325 = vmatprep.mubr.bf16.mxu0 %v651_v6  ;;  %378 = vmatprep.mubr.bf16.mxu1 %v651_v6 }
  0xdb   :  { %v110_v18 = vpop.f32.mrb[0].mxu0  ;;  %v153_v19 = vpop.f32.mrb[0].mxu1 }
  0xdc   :  { %v250_v20 = vmax.f32 %v153_v19, 0.0  ;;  %v112_v21 = vpop.f32.mrb[1].mxu0  ;;  %v155_v22 = vpop.f32.mrb[1].mxu1  ;;  %v248_v26 = vmax.f32 %v110_v18, 0.0 }
  0xdd   :  { %v251_v23 = vmax.f32 %v155_v22, 0.0  ;;  %v114_v24 = vpop.f32.mrb[2].mxu0  ;;  %v157_v25 = vpop.f32.mrb[2].mxu1  ;;  %v249_v31 = vmax.f32 %v112_v21, 0.0 }
  0xde   :  { %v256_v27 = vmax.f32 %v114_v24, 0.0  ;;  %v258_v28 = vmax.f32 %v157_v25, 0.0  ;;  %v116_v29 = vpop.f32.mrb[3].mxu0  ;;  %v159_v30 = vpop.f32.mrb[3].mxu1 }
  0xdf   :  { %v257_v32 = vmax.f32 %v116_v29, 0.0  ;;  %v259_v33 = vmax.f32 %v159_v30, 0.0 }
  0xe0   :  { %v264_v34 = vpack.c.bf16 %v256_v27, %v248_v26  ;;  %v266_v35 = vpack.c.bf16 %v258_v28, %v250_v20 }
  0xe1   :  { %v265_v36 = vpack.c.bf16 %v257_v32, %v249_v31  ;;  %v267_v37 = vpack.c.bf16 %v259_v33, %v251_v23 }
  0xe3   :  { %v196_v38 = vpop.f32.mrb[4].mxu0  ;;  %v239_v39 = vpop.f32.mrb[4].mxu1  ;;  %293 = vmatprep.subr.bf16.mxu0 %v265_v36  ;;  %346 = vmatprep.subr.bf16.mxu1 %v267_v37 }
  0xe4   :  { %v252_v41 = vmax.f32 %v196_v38, 0.0  ;;  %v254_v42 = vmax.f32 %v239_v39, 0.0  ;;  %v198_v43 = vpop.f32.mrb[5].mxu0  ;;  %v241_v44 = vpop.f32.mrb[5].mxu1  ;;  %294 = vmatpush1.bf16.msra.mxu0 %v264_v34  ;;  %347 = vmatpush1.bf16.msra.mxu1 %v266_v35 }
  0xe5   :  { %v253_v45 = vmax.f32 %v198_v43, 0.0  ;;  %v255_v46 = vmax.f32 %v241_v44, 0.0  ;;  %v200_v47 = vpop.f32.mrb[6].mxu0  ;;  %v243_v48 = vpop.f32.mrb[6].mxu1 }
  0xe6   :  { %v260_v49 = vmax.f32 %v200_v47, 0.0  ;;  %v262_v50 = vmax.f32 %v243_v48, 0.0  ;;  %v202_v51 = vpop.f32.mrb[7].mxu0  ;;  %v245_v52 = vpop.f32.mrb[7].mxu1 }
  0xe7   :  { %v261_v53 = vmax.f32 %v202_v51, 0.0  ;;  %v263_v54 = vmax.f32 %v245_v52, 0.0  ;;  %604 = vmatmul.mubr.msk.bf16.vlgmr.msra.gmra.mrb[8].mxu0 %vm286_vm2, %v625_v40  ;;  %606 = vmatmul.mubr.msk.bf16.vlgmr.msra.gmra.mrb[8].mxu1 %vm286_vm2, %v625_v40 }
  0xe8   :  { %v268_v55 = vpack.c.bf16 %v260_v49, %v252_v41  ;;  %v270_v56 = vpack.c.bf16 %v262_v50, %v254_v42  ;;  %335 = vmatprep.mubr.bf16.mxu0 %v651_v6  ;;  %388 = vmatprep.mubr.bf16.mxu1 %v651_v6 }
  0xe9   :  { %v269_v57 = vpack.c.bf16 %v261_v53, %v253_v45  ;;  %v271_v58 = vpack.c.bf16 %v263_v54, %v255_v46 }
  0xeb   :  { %399 = vmatprep.subr.bf16.mxu0 %v269_v57  ;;  %452 = vmatprep.subr.bf16.mxu1 %v271_v58 }
  0xec   :  { %400 = vmatpush1.bf16.msra.mxu0 %v268_v55  ;;  %453 = vmatpush1.bf16.msra.mxu1 %v270_v56 }
  0xef   :  { %605 = vmatmul.mubr.msk.bf16.gmra.mrb[12].mxu0 %vm286_vm2, %v626_v59  ;;  %607 = vmatmul.mubr.msk.bf16.gmra.mrb[12].mxu1 %vm286_vm2, %v626_v59 }
  0xf0   :  { %431 = vmatprep.mubr.bf16.mxu0 %v651_v6  ;;  %484 = vmatprep.mubr.bf16.mxu1 %v651_v6 }
  0xf7   :  { %608 = vmatmul.mubr.msk.bf16.vlgmr.msra.gmra.mrb[16].mxu0 %vm286_vm2, %v625_v40  ;;  %610 = vmatmul.mubr.msk.bf16.vlgmr.msra.gmra.mrb[16].mxu1 %vm286_vm2, %v625_v40 }
  0xf8   :  { %441 = vmatprep.mubr.bf16.mxu0 %v651_v6  ;;  %494 = vmatprep.mubr.bf16.mxu1 %v651_v6 }
  0xff   :  { %609 = vmatmul.mubr.msk.bf16.gmra.mrb[20].mxu0 %vm286_vm2, %v626_v59  ;;  %611 = vmatmul.mubr.msk.bf16.gmra.mrb[20].mxu1 %vm286_vm2, %v626_v59 }
 0x1ba   :  { %v327_v60 = vpop.f32.mrb[8].mxu0  ;;  %v380_v61 = vpop.f32.mrb[8].mxu1 }
 0x1bb   :  { %v505_v62 = vmax.f32 %v327_v60, 0.0  ;;  %v329_v63 = vpop.f32.mrb[9].mxu0  ;;  %v382_v0 = vpop.f32.mrb[9].mxu1  ;;  %v507_v3 = vmax.f32 %v380_v61, 0.0 }
 0x1bc   :  { %v506_v1 = vmax.f32 %v329_v63, 0.0  ;;  %v331_v2 = vpop.f32.mrb[10].mxu0  ;;  %v384_v4 = vpop.f32.mrb[10].mxu1  ;;  %v508_v11 = vmax.f32 %v382_v0, 0.0 }
 0x1bd   :  { %v513_v5 = vmax.f32 %v331_v2, 0.0  ;;  %v333_v7 = vpop.f32.mrb[11].mxu0  ;;  %v386_v8 = vpop.f32.mrb[11].mxu1  ;;  %v515_v6 = vmax.f32 %v384_v4, 0.0 }
 0x1be   :  { %v537_v9 = vmax.f32 %v505_v62, %v506_v1  ;;  %v514_v10 = vmax.f32 %v333_v7, 0.0  ;;  %v516_v16 = vmax.f32 %v386_v8, 0.0 }
 0x1c0   :  { %v538_v12 = vmax.f32 %v513_v5, %v514_v10  ;;  %v541_v13 = vmax.f32 %v537_v9, %v507_v3 }
 0x1c2   :  { %v545_v14 = vmax.f32 %v541_v13, %v508_v11  ;;  %v542_v15 = vmax.f32 %v538_v12, %v515_v6  ;;  %v337_v17 = vpop.f32.mrb[12].mxu0  ;;  %v390_v18 = vpop.f32.mrb[12].mxu1 }
 0x1c3   :  { %v521_v19 = vmax.f32 %v337_v17, 0.0  ;;  %v339_v20 = vpop.f32.mrb[13].mxu0  ;;  %v392_v21 = vpop.f32.mrb[13].mxu1  ;;  %v523_v25 = vmax.f32 %v390_v18, 0.0 }
 0x1c4   :  { %v546_v22 = vmax.f32 %v542_v15, %v516_v16  ;;  %v522_v23 = vmax.f32 %v339_v20, 0.0  ;;  %v341_v24 = vpop.f32.mrb[14].mxu0  ;;  %v394_v26 = vpop.f32.mrb[14].mxu1  ;;  %v524_v32 = vmax.f32 %v392_v21, 0.0 }
 0x1c5   :  { %v529_v27 = vmax.f32 %v341_v24, 0.0  ;;  %v343_v28 = vpop.f32.mrb[15].mxu0  ;;  %v396_v29 = vpop.f32.mrb[15].mxu1  ;;  %v531_v33 = vmax.f32 %v394_v26, 0.0 }
 0x1c6   :  { %v539_v30 = vmax.f32 %v521_v19, %v522_v23  ;;  %v530_v31 = vmax.f32 %v343_v28, 0.0  ;;  %v532_v39 = vmax.f32 %v396_v29, 0.0 }
 0x1c8   :  { %v540_v34 = vmax.f32 %v529_v27, %v530_v31  ;;  %v543_v35 = vmax.f32 %v539_v30, %v523_v25 }
 0x1ca   :  { %v547_v36 = vmax.f32 %v543_v35, %v524_v32  ;;  %v544_v37 = vmax.f32 %v540_v34, %v531_v33  ;;  %v433_v38 = vpop.f32.mrb[16].mxu0  ;;  %v486_v40 = vpop.f32.mrb[16].mxu1 }
 0x1cb   :  { %v509_v41 = vmax.f32 %v433_v38, 0.0  ;;  %v435_v42 = vpop.f32.mrb[17].mxu0  ;;  %v488_v43 = vpop.f32.mrb[17].mxu1  ;;  %v511_v51 = vmax.f32 %v486_v40, 0.0 }
 0x1cc   :  { %v548_v44 = vmax.f32 %v544_v37, %v532_v39  ;;  %v510_v45 = vmax.f32 %v435_v42, 0.0  ;;  %v437_v46 = vpop.f32.mrb[18].mxu0  ;;  %v490_v47 = vpop.f32.mrb[18].mxu1  ;;  %v512_v58 = vmax.f32 %v488_v43, 0.0 }
 0x1cd   :  { %v549_v48 = vmax.f32 %v545_v14, %v509_v41  ;;  %v517_v49 = vmax.f32 %v437_v46, 0.0  ;;  %v439_v50 = vpop.f32.mrb[19].mxu0  ;;  %v492_v52 = vpop.f32.mrb[19].mxu1  ;;  %v519_v59 = vmax.f32 %v490_v47, 0.0 }
 0x1ce   :  { %v518_v53 = vmax.f32 %v439_v50, 0.0  ;;  %v520_v1 = vmax.f32 %v492_v52, 0.0 }
 0x1cf   :  { %v553_v54 = vmax.f32 %v549_v48, %v510_v45  ;;  %v550_v55 = vmax.f32 %v546_v22, %v517_v49 }
 0x1d1   :  { %v554_v56 = vmax.f32 %v550_v55, %v518_v53  ;;  %v557_v57 = vmax.f32 %v553_v54, %v511_v51 }
 0x1d2   :  { %v443_v60 = vpop.f32.mrb[20].mxu0  ;;  %v496_v61 = vpop.f32.mrb[20].mxu1 }
 0x1d3   :  { %v561_v62 = vmax.f32 %v557_v57, %v512_v58  ;;  %v558_v63 = vmax.f32 %v554_v56, %v519_v59  ;;  %v525_v0 = vmax.f32 %v443_v60, 0.0  ;;  %v445_v2 = vpop.f32.mrb[21].mxu0  ;;  %v498_v3 = vpop.f32.mrb[21].mxu1  ;;  %v527_v6 = vmax.f32 %v496_v61, 0.0 }
 0x1d4   :  { %v526_v4 = vmax.f32 %v445_v2, 0.0  ;;  %v447_v5 = vpop.f32.mrb[22].mxu0  ;;  %v500_v7 = vpop.f32.mrb[22].mxu1  ;;  %v528_v18 = vmax.f32 %v498_v3, 0.0 }
 0x1d5   :  { %565 = vst [vmem:[#allocation2] sm:$0xff] %v561_v62  ;;  %v551_v8 = vmax.f32 %v547_v36, %v525_v0  ;;  %v562_v9 = vmax.f32 %v558_v63, %v520_v1  ;;  %v533_v10 = vmax.f32 %v447_v5, 0.0  ;;  %v449_v11 = vpop.f32.mrb[23].mxu0  ;;  %v502_v12 = vpop.f32.mrb[23].mxu1  ;;  %v535_v19 = vmax.f32 %v500_v7, 0.0 }
 0x1d6   :  { %v534_v13 = vmax.f32 %v449_v11, 0.0  ;;  %v536_v22 = vmax.f32 %v502_v12, 0.0 }
 0x1d7   :  { %566 = vst [vmem:[#allocation2 + $0x8] sm:$0xff] %v562_v9  ;;  %v555_v14 = vmax.f32 %v551_v8, %v526_v4  ;;  %v552_v15 = vmax.f32 %v548_v44, %v533_v10 }
 0x1d9   :  { %v556_v16 = vmax.f32 %v552_v15, %v534_v13  ;;  %v559_v17 = vmax.f32 %v555_v14, %v527_v6 }
 0x1db   :  { %v563_v20 = vmax.f32 %v559_v17, %v528_v18  ;;  %v560_v21 = vmax.f32 %v556_v16, %v535_v19 }
 0x1dd   :  { %567 = vst [vmem:[#allocation2 + $0x10] sm:$0xff] %v563_v20  ;;  %v564_v23 = vmax.f32 %v560_v21, %v536_v22 }
 0x1df   :  { %568 = vst [vmem:[#allocation2 + $0x18] sm:$0xff] %v564_v23 }
 0x1e0   :  { %638 = shalt.err (!%p635_p4)
}
 0x1e1   :  { %s639_s28 = scalar_lea.hbm %s739_s3, 512 }
 0x1e2   :  { %p640_p5 = scmp.ne.s32.totalorder %s739_s3, %s639_s28  ;;  %p643_p6 = scmp.lt.u32.totalorder %s639_s28, %s739_s3 }
 0x1e4   :  { %p645_p7 = pnand %p643_p6, %p640_p5 }
 0x1e6   :  { %648 = shalt.err (!%p645_p7)
}
 0x1e7   :  { %s653_s6 = smov 128   ;;  %s654_s7 = smov 8  }
 0x1e8   :  { %580 = dma.vmem_to_hbm [thread:$0]  %s575_s24, 512, %s739_s3, [#allocation3], %s653_s6, %s653_s6, %s654_s7  }
 0x1e9   :  { %649 = dma.done.wait [#allocation3], 512  }
 0x1ea   :  { %650 = vsyncadd [#allocation3], 4294966784 }
 0x1eb   :  { %584 = vsyncpa [#allocation3], 1 }

</bundles_post_ra>
